<compile_context>
chip_gen: v5e
topology: v5e:2x2
jax: 0.10.0
libtpu: 0.0.40
codegen_flags: <defaults>
</compile_context>

<pallas_src>
import jax
import jax.numpy as jnp
from jax.experimental import pallas as pl
from jax.experimental.pallas import tpu as pltpu


# ----------------------------- ReHU -----------------------------------------
_REHU_D = 0.1
_REHU_A_HALF = 0.5 / _REHU_D       # (1/d)/2 = 5.0
_REHU_HALF_D = _REHU_D / 2.0       # d/2     = 0.05


def _rehu(x):
    # ReHU(x) = max(clamp(sign(x) * (1/d)/2 * x^2, 0, d/2), x - d/2)
    # sign(x) * x^2 == x * |x|  -> single abs instead of compare+select.
    quad = jnp.clip(_REHU_A_HALF * x * jnp.abs(x), 0.0, _REHU_HALF_D)
    return jnp.maximum(quad, x - _REHU_HALF_D)


# --------------------------- forward wrapper ---------------------------------
def mylinear_forward(x, params, *, compute_dtype=jnp.bfloat16):
    """x: (B, 2*dim) f32.  params: PyTorch-shaped weights/biases.  Returns (B, 1) f32."""
    B, two_d = x.shape
    eight_d = 4 * two_d                      # 8*dim  (two_d == 2*dim)
    cdt = compute_dtype

    # One-time preprocessing outside the kernel: fold |W| and the MXU-input
    # cast into the stored weights (native (out, in) orientation -> W @ x).
    w0 = params["w0"].astype(cdt)                    # (2D, 2D)
    w1 = jnp.abs(params["w1"]).astype(cdt)           # (8D, 2D)
    w2 = jnp.abs(params["w2"]).astype(cdt)           # (2D, 8D)
    w3 = jnp.abs(params["w3"]).astype(cdt)           # (1,  2D)

    # Pack the four biases into one (P, 1) column buffer, segments 8-aligned.
    def _pad8(n):
        return ((n + 7) // 8) * 8

    sizes = (two_d, eight_d, two_d, 1)
    offs = []
    off = 0
    for s in sizes:
        offs.append(off)
        off += _pad8(s)
    P = off
    bias = jnp.zeros((P, 1), jnp.float32)
    for o, s, name in zip(offs, sizes, ("b0", "b1", "b2", "b3")):
        bias = bias.at[o:o + s, 0].set(params[name].reshape(-1).astype(jnp.float32))
    o0, o1, o2, o3 = offs

    # Batch on lanes: transpose to (features, B) and pad B to the lane tile.
    TB = 512 if B >= 512 else (256 if B >= 256 else 128)
    Bp = ((B + TB - 1) // TB) * TB
    xt = x.T.astype(cdt)                              # (2D, B)
    if Bp != B:
        xt = jnp.pad(xt, ((0, 0), (0, Bp - B)))

    def kernel(x_ref, w0_ref, w1_ref, w2_ref, w3_ref, b_ref, o_ref):
        xa = x_ref[...]                               # (2D, TB)  compute dtype
        b0 = b_ref[o0:o0 + two_d, :]                  # (2D, 1)   f32
        b1 = b_ref[o1:o1 + eight_d, :]                # (8D, 1)
        b2 = b_ref[o2:o2 + two_d, :]                  # (2D, 1)
        b3 = b_ref[o3:o3 + 1, :]                      # (1, 1)

        # z1 = ReHU(W0 @ x + b0)            -- plain nn.Linear
        z1 = _rehu(jnp.dot(w0_ref[...], xa,
                           preferred_element_type=jnp.float32) + b0)   # (2D, TB)
        # z2 = ReHU(|W1| @ z1 + b1)
        z2 = _rehu(jnp.dot(w1_ref[...], z1.astype(cdt),
                           preferred_element_type=jnp.float32) + b1)   # (8D, TB)
        # z3 = ReHU(|W2| @ z2 + b2)
        z3 = _rehu(jnp.dot(w2_ref[...], z2.astype(cdt),
                           preferred_element_type=jnp.float32) + b2)   # (2D, TB)
        # z4 = ReHU(|W3| @ z3 + b3)
        z4 = _rehu(jnp.dot(w3_ref[...], z3.astype(cdt),
                           preferred_element_type=jnp.float32) + b3)   # (1, TB)

        o_ref[...] = z4.astype(o_ref.dtype)           # lane-dense (1, TB) store

    out = pl.pallas_call(
        kernel,
        out_shape=jax.ShapeDtypeStruct((1, Bp), jnp.float32),
        grid=(Bp // TB,),
        in_specs=[
            pl.BlockSpec((two_d, TB), lambda i: (0, i)),        # x batch tile
            pl.BlockSpec((two_d, two_d), lambda i: (0, 0)),     # W0   (resident)
            pl.BlockSpec((eight_d, two_d), lambda i: (0, 0)),   # |W1| (resident)
            pl.BlockSpec((two_d, eight_d), lambda i: (0, 0)),   # |W2| (resident)
            pl.BlockSpec((1, two_d), lambda i: (0, 0)),         # |W3| (resident)
            pl.BlockSpec((P, 1), lambda i: (0, 0)),             # packed biases
        ],
        out_specs=pl.BlockSpec((1, TB), lambda i: (0, i)),
        compiler_params=pltpu.CompilerParams(
            dimension_semantics=("parallel",)),
    )(xt, w0, w1, w2, w3, bias)

    return out[:, :B].T                               # back to (B, 1)


# --------------------------- params & references ------------------------------
def init_params(dim, key):
    """PyTorch-native parameter shapes / init ranges."""
    k = jax.random.split(key, 8)
    lim = 0.001
    two_d, eight_d = 2 * dim, 8 * dim
    w0_bound = float(1.0 / (two_d ** 0.5))
    return {
        "w0": jax.random.uniform(k[0], (two_d, two_d), jnp.float32, -w0_bound, w0_bound),
        "b0": jax.random.uniform(k[1], (two_d,), jnp.float32, -w0_bound, w0_bound),
        "w1": jax.random.uniform(k[2], (eight_d, two_d), jnp.float32, -lim, lim),
        "b1": jax.random.uniform(k[3], (eight_d,), jnp.float32, -lim, lim),
        "w2": jax.random.uniform(k[4], (two_d, eight_d), jnp.float32, -lim, lim),
        "b2": jax.random.uniform(k[5], (two_d,), jnp.float32, -lim, lim),
        "w3": jax.random.uniform(k[6], (1, two_d), jnp.float32, -lim, lim),
        "b3": jax.random.uniform(k[7], (1,), jnp.float32, -lim, lim),
    }


def reference_forward(x, p):
    """Pure-f32 reference matching the PyTorch module exactly."""
    def rehu(v):
        return jnp.maximum(jnp.clip(jnp.sign(v) * 5.0 * v * v, 0.0, 0.05), v - 0.05)
    z1 = rehu(x @ p["w0"].T + p["b0"])
    z2 = rehu(z1 @ jnp.abs(p["w1"]).T + p["b1"])
    z3 = rehu(z2 @ jnp.abs(p["w2"]).T + p["b2"])
    z4 = rehu(z3 @ jnp.abs(p["w3"]).T + p["b3"])
    return z4


def reference_forward_mixed(x, p, cdt):
    """Same math, but with matmul operands cast to `cdt` (bf16 MXU path)."""
    def rehu(v):
        return jnp.maximum(jnp.clip(5.0 * v * jnp.abs(v), 0.0, 0.05), v - 0.05)

    def lin(a, w, b):
        return jnp.dot(a.astype(cdt), w.astype(cdt).T,
                       preferred_element_type=jnp.float32) + b

    z1 = rehu(lin(x, p["w0"], p["b0"]))
    z2 = rehu(lin(z1, jnp.abs(p["w1"]), p["b1"]))
    z3 = rehu(lin(z2, jnp.abs(p["w2"]), p["b2"]))
    z4 = rehu(lin(z3, jnp.abs(p["w3"]), p["b3"]))
    return z4


# ------------------------------------ main ------------------------------------
if __name__ == "__main__":
    dim = 4          # size_in
    batch = 8
    key = jax.random.PRNGKey(0)
    kx, kp = jax.random.split(key)

    x = jax.random.normal(kx, (batch, 2 * dim), dtype=jnp.float32)
    params = init_params(dim, kp)

    fwd = jax.jit(mylinear_forward)          # default: bf16 MXU operands
    out = jax.block_until_ready(fwd(x, params))

    assert out.shape == (batch, 1)

    # Tight check vs a reference that uses the same bf16-operand / f32-accum path.
    ref_mixed = reference_forward_mixed(x, params, jnp.bfloat16)
    assert jnp.allclose(out, ref_mixed, atol=1e-6, rtol=1e-3)

    # Semantic sanity check vs the pure-f32 PyTorch-equivalent reference.
    ref_f32 = reference_forward(x, params)
    assert jnp.allclose(out, ref_f32, atol=1e-6, rtol=5e-2)

    print("KERNEL_OK")
</pallas_src>

<mosaic_0001>
module attributes {stable_mosaic.version = 11 : i64} {
  func.func @kernel(%arg0: i32, %arg1: memref<8x128xbf16, #tpu.memory_space<vmem>>, %arg2: memref<8x8xbf16, #tpu.memory_space<vmem>>, %arg3: memref<32x8xbf16, #tpu.memory_space<vmem>>, %arg4: memref<8x32xbf16, #tpu.memory_space<vmem>>, %arg5: memref<1x8xbf16, #tpu.memory_space<vmem>>, %arg6: memref<56x1xf32, #tpu.memory_space<vmem>>, %arg7: memref<1x128xf32, #tpu.memory_space<vmem>>) attributes {dimension_semantics = [#tpu.dimension_semantics<parallel>], iteration_bounds = array<i64: 1>, scalar_prefetch = 0 : i64, scratch_operands = 0 : i64, tpu.core_type = #tpu.core_type<tc>, window_params = [{transform_indices = @transform_0, window_bounds = array<i64: 8, 128>}, {pipeline_mode = #tpu.pipeline_mode<synchronous>, transform_indices = @transform_1, window_bounds = array<i64: 8, 8>}, {pipeline_mode = #tpu.pipeline_mode<synchronous>, transform_indices = @transform_2, window_bounds = array<i64: 32, 8>}, {pipeline_mode = #tpu.pipeline_mode<synchronous>, transform_indices = @transform_3, window_bounds = array<i64: 8, 32>}, {pipeline_mode = #tpu.pipeline_mode<synchronous>, transform_indices = @transform_4, window_bounds = array<i64: 1, 8>}, {pipeline_mode = #tpu.pipeline_mode<synchronous>, transform_indices = @transform_5, window_bounds = array<i64: 56, 1>}, {transform_indices = @transform_6, window_bounds = array<i64: 1, 128>}]} {
    %c0 = arith.constant 0 : index
    %c0_0 = arith.constant 0 : index
    %0 = vector.load %arg1[%c0, %c0_0] : memref<8x128xbf16, #tpu.memory_space<vmem>>, vector<8x128xbf16>
    %c0_1 = arith.constant 0 : index
    %c0_2 = arith.constant 0 : index
    %1 = vector.load %arg6[%c0_1, %c0_2] : memref<56x1xf32, #tpu.memory_space<vmem>>, vector<8x1xf32>
    %c8 = arith.constant 8 : index
    %c0_3 = arith.constant 0 : index
    %2 = vector.load %arg6[%c8, %c0_3] : memref<56x1xf32, #tpu.memory_space<vmem>>, vector<32x1xf32>
    %c40 = arith.constant 40 : index
    %c0_4 = arith.constant 0 : index
    %3 = vector.load %arg6[%c40, %c0_4] : memref<56x1xf32, #tpu.memory_space<vmem>>, vector<8x1xf32>
    %c48 = arith.constant 48 : index
    %c0_5 = arith.constant 0 : index
    %4 = vector.load %arg6[%c48, %c0_5] : memref<56x1xf32, #tpu.memory_space<vmem>>, vector<1x1xf32>
    %c0_6 = arith.constant 0 : index
    %c0_7 = arith.constant 0 : index
    %5 = vector.load %arg2[%c0_6, %c0_7] : memref<8x8xbf16, #tpu.memory_space<vmem>>, vector<8x8xbf16>
    %cst = arith.constant dense<0.000000e+00> : vector<8x128xf32>
    %6 = tpu.matmul %5, %0, %cst {dimension_numbers = #tpu.dot_dimension_numbers<[1], [0], [0], [1], [0, 0, 1, 1], [], []>} : vector<8x8xbf16>, vector<8x128xbf16>, vector<8x128xf32> -> vector<8x128xf32>
    %7 = vector.broadcast %1 : vector<8x1xf32> to vector<8x128xf32>
    %8 = arith.addf %6, %7 : vector<8x128xf32>
    %cst_8 = arith.constant 5.000000e+00 : f32
    %9 = vector.broadcast %cst_8 : f32 to vector<8x128xf32>
    %10 = arith.mulf %9, %8 : vector<8x128xf32>
    %11 = math.absf %8 : vector<8x128xf32>
    %12 = arith.mulf %10, %11 : vector<8x128xf32>
    %cst_9 = arith.constant 0.000000e+00 : f32
    %cst_10 = arith.constant 5.000000e-02 : f32
    %13 = vector.broadcast %cst_9 : f32 to vector<8x128xf32>
    %14 = arith.maximumf %13, %12 : vector<8x128xf32>
    %15 = vector.broadcast %cst_10 : f32 to vector<8x128xf32>
    %16 = arith.minimumf %15, %14 : vector<8x128xf32>
    %cst_11 = arith.constant 5.000000e-02 : f32
    %17 = vector.broadcast %cst_11 : f32 to vector<8x128xf32>
    %18 = arith.subf %8, %17 : vector<8x128xf32>
    %19 = arith.maximumf %16, %18 : vector<8x128xf32>
    %c0_12 = arith.constant 0 : index
    %c0_13 = arith.constant 0 : index
    %20 = vector.load %arg3[%c0_12, %c0_13] : memref<32x8xbf16, #tpu.memory_space<vmem>>, vector<32x8xbf16>
    %21 = arith.truncf %19 : vector<8x128xf32> to vector<8x128xbf16>
    %cst_14 = arith.constant dense<0.000000e+00> : vector<32x128xf32>
    %22 = tpu.matmul %20, %21, %cst_14 {dimension_numbers = #tpu.dot_dimension_numbers<[1], [0], [0], [1], [0, 0, 1, 1], [], []>} : vector<32x8xbf16>, vector<8x128xbf16>, vector<32x128xf32> -> vector<32x128xf32>
    %23 = vector.broadcast %2 : vector<32x1xf32> to vector<32x128xf32>
    %24 = arith.addf %22, %23 : vector<32x128xf32>
    %cst_15 = arith.constant 5.000000e+00 : f32
    %25 = vector.broadcast %cst_15 : f32 to vector<32x128xf32>
    %26 = arith.mulf %25, %24 : vector<32x128xf32>
    %27 = math.absf %24 : vector<32x128xf32>
    %28 = arith.mulf %26, %27 : vector<32x128xf32>
    %cst_16 = arith.constant 0.000000e+00 : f32
    %cst_17 = arith.constant 5.000000e-02 : f32
    %29 = vector.broadcast %cst_16 : f32 to vector<32x128xf32>
    %30 = arith.maximumf %29, %28 : vector<32x128xf32>
    %31 = vector.broadcast %cst_17 : f32 to vector<32x128xf32>
    %32 = arith.minimumf %31, %30 : vector<32x128xf32>
    %cst_18 = arith.constant 5.000000e-02 : f32
    %33 = vector.broadcast %cst_18 : f32 to vector<32x128xf32>
    %34 = arith.subf %24, %33 : vector<32x128xf32>
    %35 = arith.maximumf %32, %34 : vector<32x128xf32>
    %c0_19 = arith.constant 0 : index
    %c0_20 = arith.constant 0 : index
    %36 = vector.load %arg4[%c0_19, %c0_20] : memref<8x32xbf16, #tpu.memory_space<vmem>>, vector<8x32xbf16>
    %37 = arith.truncf %35 : vector<32x128xf32> to vector<32x128xbf16>
    %cst_21 = arith.constant dense<0.000000e+00> : vector<8x128xf32>
    %38 = tpu.matmul %36, %37, %cst_21 {dimension_numbers = #tpu.dot_dimension_numbers<[1], [0], [0], [1], [0, 0, 1, 1], [], []>} : vector<8x32xbf16>, vector<32x128xbf16>, vector<8x128xf32> -> vector<8x128xf32>
    %39 = vector.broadcast %3 : vector<8x1xf32> to vector<8x128xf32>
    %40 = arith.addf %38, %39 : vector<8x128xf32>
    %cst_22 = arith.constant 5.000000e+00 : f32
    %41 = vector.broadcast %cst_22 : f32 to vector<8x128xf32>
    %42 = arith.mulf %41, %40 : vector<8x128xf32>
    %43 = math.absf %40 : vector<8x128xf32>
    %44 = arith.mulf %42, %43 : vector<8x128xf32>
    %cst_23 = arith.constant 0.000000e+00 : f32
    %cst_24 = arith.constant 5.000000e-02 : f32
    %45 = vector.broadcast %cst_23 : f32 to vector<8x128xf32>
    %46 = arith.maximumf %45, %44 : vector<8x128xf32>
    %47 = vector.broadcast %cst_24 : f32 to vector<8x128xf32>
    %48 = arith.minimumf %47, %46 : vector<8x128xf32>
    %cst_25 = arith.constant 5.000000e-02 : f32
    %49 = vector.broadcast %cst_25 : f32 to vector<8x128xf32>
    %50 = arith.subf %40, %49 : vector<8x128xf32>
    %51 = arith.maximumf %48, %50 : vector<8x128xf32>
    %c0_26 = arith.constant 0 : index
    %c0_27 = arith.constant 0 : index
    %52 = vector.load %arg5[%c0_26, %c0_27] : memref<1x8xbf16, #tpu.memory_space<vmem>>, vector<1x8xbf16>
    %53 = arith.truncf %51 : vector<8x128xf32> to vector<8x128xbf16>
    %cst_28 = arith.constant dense<0.000000e+00> : vector<1x128xf32>
    %54 = tpu.matmul %52, %53, %cst_28 {dimension_numbers = #tpu.dot_dimension_numbers<[1], [0], [0], [1], [0, 0, 1, 1], [], []>} : vector<1x8xbf16>, vector<8x128xbf16>, vector<1x128xf32> -> vector<1x128xf32>
    %55 = vector.broadcast %4 : vector<1x1xf32> to vector<1x128xf32>
    %56 = arith.addf %54, %55 : vector<1x128xf32>
    %cst_29 = arith.constant 5.000000e+00 : f32
    %57 = vector.broadcast %cst_29 : f32 to vector<1x128xf32>
    %58 = arith.mulf %57, %56 : vector<1x128xf32>
    %59 = math.absf %56 : vector<1x128xf32>
    %60 = arith.mulf %58, %59 : vector<1x128xf32>
    %cst_30 = arith.constant 0.000000e+00 : f32
    %cst_31 = arith.constant 5.000000e-02 : f32
    %61 = vector.broadcast %cst_30 : f32 to vector<1x128xf32>
    %62 = arith.maximumf %61, %60 : vector<1x128xf32>
    %63 = vector.broadcast %cst_31 : f32 to vector<1x128xf32>
    %64 = arith.minimumf %63, %62 : vector<1x128xf32>
    %cst_32 = arith.constant 5.000000e-02 : f32
    %65 = vector.broadcast %cst_32 : f32 to vector<1x128xf32>
    %66 = arith.subf %56, %65 : vector<1x128xf32>
    %67 = arith.maximumf %64, %66 : vector<1x128xf32>
    %c0_33 = arith.constant 0 : index
    %c0_34 = arith.constant 0 : index
    %68 = vector.load %arg7[%c0_33, %c0_34] : memref<1x128xf32, #tpu.memory_space<vmem>>, vector<1x128xf32>
    tpu.vector_store %arg7[%c0_33, %c0_34], %67 {strides = array<i32>} : memref<1x128xf32, #tpu.memory_space<vmem>>, vector<1x128xf32>,
    return
  }
  func.func @transform_0(%arg0: i32) -> (i32, i32) {
    %c0_i32 = arith.constant 0 : i32
    %c0_i32_0 = arith.constant 0 : i32
    return %c0_i32, %arg0 : i32, i32
  }
  func.func @transform_1(%arg0: i32) -> (i32, i32) {
    %c0_i32 = arith.constant 0 : i32
    %c0_i32_0 = arith.constant 0 : i32
    %c0_i32_1 = arith.constant 0 : i32
    return %c0_i32, %c0_i32_0 : i32, i32
  }
  func.func @transform_2(%arg0: i32) -> (i32, i32) {
    %c0_i32 = arith.constant 0 : i32
    %c0_i32_0 = arith.constant 0 : i32
    %c0_i32_1 = arith.constant 0 : i32
    return %c0_i32, %c0_i32_0 : i32, i32
  }
  func.func @transform_3(%arg0: i32) -> (i32, i32) {
    %c0_i32 = arith.constant 0 : i32
    %c0_i32_0 = arith.constant 0 : i32
    %c0_i32_1 = arith.constant 0 : i32
    return %c0_i32, %c0_i32_0 : i32, i32
  }
  func.func @transform_4(%arg0: i32) -> (i32, i32) {
    %c0_i32 = arith.constant 0 : i32
    %c0_i32_0 = arith.constant 0 : i32
    %c0_i32_1 = arith.constant 0 : i32
    return %c0_i32, %c0_i32_0 : i32, i32
  }
  func.func @transform_5(%arg0: i32) -> (i32, i32) {
    %c0_i32 = arith.constant 0 : i32
    %c0_i32_0 = arith.constant 0 : i32
    %c0_i32_1 = arith.constant 0 : i32
    return %c0_i32, %c0_i32_0 : i32, i32
  }
  func.func @transform_6(%arg0: i32) -> (i32, i32) {
    %c0_i32 = arith.constant 0 : i32
    %c0_i32_0 = arith.constant 0 : i32
    return %c0_i32, %arg0 : i32, i32
  }
}

</mosaic_0001>

<bundles_post_ra>
// kernel: mylinear_forward.1
= control target key start
LH: loop header
LB: loop body
LE: loop exit
PB: predicated region body
PF: predicated region fallthrough
CT: control target
= control target key end

     0   :  { %vm42_vm0 = vcmask 1043456   ;;  %v253_v0 = vmov 0   ;;  %vm38_vm1 = vcmask 64512   ;;  %vm165_vm2 = vcmask 261120   ;;  %s338_s5 = inlined_call_operand.vmem [shape: f32[56,1], index: 5, kind: input, shape index: {}]   ;;  %s339_s0 = inlined_call_operand.vmem [shape: bf16[8,128], index: 0, kind: input, shape index: {}]   ;;  %s340_s1 = inlined_call_operand.vmem [shape: bf16[8,8], index: 1, kind: input, shape index: {}]   ;;  %s341_s2 = inlined_call_operand.vmem [shape: bf16[32,8], index: 2, kind: input, shape index: {}]   ;;  %s342_s3 = inlined_call_operand.vmem [shape: bf16[8,32], index: 3, kind: input, shape index: {}]   ;;  %s343_s4 = inlined_call_operand.vmem [shape: bf16[1,8], index: 4, kind: input, shape index: {}]   ;;  %s344_s6 = inlined_call_operand.vmem [shape: f32[1,128], index: 6, kind: output, shape index: {}]  }
   0x1   :  { %250 = vset.pattern.permute.xlu0 %v253_v0  ;;  %v25_v1 = vld [vmem:[%s338_s5] sm:$0xff]  ;;  %251 = vset.pattern.permute.xlu1 %v253_v0  ;;  %v28_v5 = vld [vmem:[%s338_s5 + $0x18] sm:$0xff]  ;;  %v31_v6 = vld [vmem:[%s338_s5 + $0x30] sm:$0x1] }
   0x2   :  { %v24_v2 = vld [vmem:[%s339_s0] sm:$0xf]  ;;  %35 = vperm.xlu0 %250, %v25_v1   ;;  %252 = vset.pattern.permute.xlu2 %v253_v0  ;;  %v26_v8 = vld [vmem:[%s338_s5 + $0x8] sm:$0xff]  ;;  %v27_v14 = vld [vmem:[%s338_s5 + $0x10] sm:$0xff] }
   0x3   :  { %v44_v3 = vsel %vm42_vm0, %v24_v2, 0  ;;  %v32_v4 = vld [vmem:[%s340_s1] sm:$0xf]  ;;  %78 = vperm.xlu2 %252, %v27_v14   ;;  %v30_v20 = vld [vmem:[%s338_s5 + $0x28] sm:$0xff] }
   0x4   :  { %53 = vmatpush.bf16.msra.mxu0 %v44_v3  ;;  %v29_v7 = vld [vmem:[%s338_s5 + $0x20] sm:$0xff]  ;;  %v248_v25 = vld [vmem:[%s341_s2 + $0x8] sm:$0xff] }
   0x5   :  { %88 = vperm.xlu1 %251, %v29_v7   ;;  %v247_v24 = vld [vmem:[%s341_s2] sm:$0xff] }
   0x7   :  { %227 = vmatmul.msk.bf16.vlgmr.msra.gmra.mxu0 %vm38_vm1, %v32_v4  ;;  %v157_v4 = vld [vmem:[%s342_s3] sm:$0xf] }
   0xa   :  { %83 = vperm.xlu0 %250, %v28_v5  }
   0xb   :  { %162 = vperm.xlu2 %252, %v30_v20  }
   0xd   :  { %73 = vperm.xlu1 %251, %v26_v8  }
  0x12   :  { %193 = vperm.xlu0 %250, %v31_v6  }
  0x5d   :  { %v79_v29 = vpop.permute.xlu2 %78 }
  0x65   :  { %v163_v5 = vpop.permute.xlu2 %162 }
  0x74   :  { %v36_v9 = vpop.permute.xlu0 %35 }
  0x77   :  { %v89_v27 = vpop.permute.xlu1 %88 }
  0x7c   :  { %v84_v30 = vpop.permute.xlu0 %83 }
  0x7f   :  { %v74_v31 = vpop.permute.xlu1 %73 }
  0x84   :  { %v55_v10 = vpop.f32.mrf.mxu0 }
  0x85   :  { %v56_v11 = vadd.f32 %v55_v10, %v36_v9 }
  0x87   :  { %v59_v12 = vmul.f32 5.0, %v56_v11  ;;  %v60_v13 = vand.u32 2147483647, %v56_v11  ;;  %v228_v19 = vadd.f32 -0.05, %v56_v11 }
  0x89   :  { %v61_v15 = vmul.f32 %v60_v13, %v59_v12 }
  0x8b   :  { %v62_v16 = vmax.f32 %v61_v15, 0.0 }
  0x8c   :  { %v57_v17 = vpop.f32.mrf.mxu0 }
  0x8d   :  { %v63_v18 = vmin.f32 %v62_v16, 0.05 }
  0x8f   :  { %v65_v21 = vmax.f32 %v63_v18, %v228_v19  ;;  %v189_v18 = vld [vmem:[%s343_s4] sm:$0x1]  ;;  %v194_v19 = vpop.permute.xlu0 %193 }
  0x91   :  { %v70_v22 = vpack.c.bf16 %v65_v21, %v65_v21 }
  0x93   :  { %v108_v23 = vsel %vm42_vm0, %v70_v22, 0 }
  0x94   :  { %117 = vmatpush.bf16.msra.mxu1 %v108_v23 }
  0x97   :  { %237 = vmatmul.msk.bf16.vlgmr.msra.gmra.mxu1 %vm38_vm1, %v247_v24 }
  0xa7   :  { %238 = vmatmul.msk.bf16.gmra.mxu1 %vm38_vm1, %v248_v25 }
 0x114   :  { %v119_v26 = vpop.f32.mrf.mxu1 }
 0x115   :  { %v120_v35 = vadd.f32 %v119_v26, %v74_v31 }
 0x117   :  { %v129_v40 = vmul.f32 5.0, %v120_v35  ;;  %v133_v41 = vand.u32 2147483647, %v120_v35  ;;  %v239_v63 = vadd.f32 -0.05, %v120_v35 }
 0x119   :  { %v137_v49 = vmul.f32 %v133_v41, %v129_v40 }
 0x11b   :  { %v141_v54 = vmax.f32 %v137_v49, 0.0 }
 0x11c   :  { %v121_v28 = vpop.f32.mrf.mxu1 }
 0x11d   :  { %v122_v32 = vadd.f32 %v121_v28, %v79_v29  ;;  %v145_v62 = vmin.f32 %v141_v54, 0.05 }
 0x11f   :  { %v130_v38 = vmul.f32 5.0, %v122_v32  ;;  %v134_v39 = vand.u32 2147483647, %v122_v32  ;;  %v240_v59 = vadd.f32 -0.05, %v122_v32  ;;  %v153_v2 = vmax.f32 %v145_v62, %v239_v63 }
 0x121   :  { %v138_v44 = vmul.f32 %v134_v39, %v130_v38 }
 0x123   :  { %v142_v50 = vmax.f32 %v138_v44, 0.0 }
 0x124   :  { %v124_v33 = vpop.f32.mrf.mxu1 }
 0x125   :  { %v125_v34 = vadd.f32 %v124_v33, %v84_v30  ;;  %v146_v55 = vmin.f32 %v142_v50, 0.05 }
 0x127   :  { %v131_v36 = vmul.f32 5.0, %v125_v34  ;;  %v135_v37 = vand.u32 2147483647, %v125_v34  ;;  %v241_v57 = vadd.f32 -0.05, %v125_v34  ;;  %v154_v1 = vmax.f32 %v146_v55, %v240_v59 }
 0x129   :  { %v139_v42 = vmul.f32 %v135_v37, %v131_v36  ;;  %v158_v3 = vpack.c.bf16 %v154_v1, %v153_v2 }
 0x12b   :  { %v143_v48 = vmax.f32 %v139_v42, 0.0 }
 0x12c   :  { %v126_v43 = vpop.f32.mrf.mxu1 }
 0x12d   :  { %v127_v45 = vadd.f32 %v126_v43, %v89_v27  ;;  %v147_v53 = vmin.f32 %v143_v48, 0.05 }
 0x12f   :  { %v132_v46 = vmul.f32 5.0, %v127_v45  ;;  %v136_v47 = vand.u32 2147483647, %v127_v45  ;;  %v242_v58 = vadd.f32 -0.05, %v127_v45  ;;  %v155_v60 = vmax.f32 %v147_v53, %v241_v57 }
 0x131   :  { %v140_v51 = vmul.f32 %v136_v47, %v132_v46 }
 0x133   :  { %v144_v52 = vmax.f32 %v140_v51, 0.0 }
 0x135   :  { %v148_v56 = vmin.f32 %v144_v52, 0.05 }
 0x137   :  { %v156_v61 = vmax.f32 %v148_v56, %v242_v58 }
 0x139   :  { %v159_v0 = vpack.c.bf16 %v156_v61, %v155_v60 }
 0x13b   :  { %175 = vmatpush.bf16.msra.mxu2 %v159_v0 }
 0x13f   :  { %176 = vmatpush.bf16.msra.mxu2 %v158_v3 }
 0x142   :  { %243 = vmatmul.msk.bf16.vlgmr.msra.gmra.mxu2 %vm165_vm2, %v157_v4 }
 0x1c5   :  { %v178_v6 = vpop.f32.mrf.mxu2 }
 0x1c6   :  { %v179_v7 = vadd.f32 %v178_v6, %v163_v5 }
 0x1c8   :  { %v182_v8 = vmul.f32 5.0, %v179_v7  ;;  %v183_v9 = vand.u32 2147483647, %v179_v7  ;;  %v244_v14 = vadd.f32 -0.05, %v179_v7 }
 0x1ca   :  { %v184_v10 = vmul.f32 %v183_v9, %v182_v8 }
 0x1cc   :  { %v185_v11 = vmax.f32 %v184_v10, 0.0 }
 0x1cd   :  { %v180_v12 = vpop.f32.mrf.mxu2 }
 0x1ce   :  { %v186_v13 = vmin.f32 %v185_v11, 0.05 }
 0x1d0   :  { %v188_v15 = vmax.f32 %v186_v13, %v244_v14 }
 0x1d2   :  { %v190_v16 = vpack.c.bf16 %v188_v15, %v188_v15 }
 0x1d4   :  { %v200_v17 = vsel %vm42_vm0, %v190_v16, 0 }
 0x1d5   :  { %209 = vmatpush.bf16.msra.mxu3 %v200_v17 }
 0x1d8   :  { %245 = vmatmul.msk.bf16.vlgmr.msra.gmra.mxu3 %vm38_vm1, %v189_v18 }
 0x25b   :  { %v211_v20 = vpop.f32.mrf.mxu3 }
 0x25c   :  { %v212_v21 = vadd.f32 %v211_v20, %v194_v19 }
 0x25e   :  { %v215_v22 = vmul.f32 5.0, %v212_v21  ;;  %v216_v23 = vand.u32 2147483647, %v212_v21  ;;  %v246_v28 = vadd.f32 -0.05, %v212_v21 }
 0x260   :  { %v217_v24 = vmul.f32 %v216_v23, %v215_v22 }
 0x262   :  { %v218_v25 = vmax.f32 %v217_v24, 0.0 }
 0x263   :  { %v213_v26 = vpop.f32.mrf.mxu3 }
 0x264   :  { %v219_v27 = vmin.f32 %v218_v25, 0.05 }
 0x266   :  { %v221_v29 = vmax.f32 %v219_v27, %v246_v28 }
 0x268   :  { %222 = vst [vmem:[%s344_s6] sm:$0x1] %v221_v29 }

</bundles_post_ra>
